<compile_context>
chip_gen: v7x
topology: tpu7x:2x2x1
jax: 0.10.0
libtpu: 0.0.40
codegen_flags: <defaults>
</compile_context>

<pallas_src>
import functools

import jax
import jax.numpy as jnp
from jax import lax
from jax.experimental import pallas as pl
from jax.experimental.pallas import tpu as pltpu

NEG_SLOPE = 0.2   # LeakyReLU negative slope
EPS = 1e-8        # PartialConv2d epsilon


# ---------------------------------------------------------------------------
# Pallas kernel: one grid step == one (batch element, lane tile of flat output).
# ---------------------------------------------------------------------------
def _partial_conv_kernel(s_ref, w_ref, b_ref, out_ref, umask_ref, *,
                         c_out, kh, kw, w_pad, lane_tile, slide_winsize):
    # s_ref   : (1, Cin+1, M_flat)  padded [x*mask ; mask.sum(Cin)] in flat (H_pad*W_pad)
    #                               coordinates for one batch element (same block across
    #                               all lane tiles -> DMA'd from HBM once per element).
    # w_ref   : (kh*kw, Cout+1, Cin+1) per-tap extended weight:
    #              rows 0..Cout-1 -> spectrally-normalized conv weight (last col = 0)
    #              row  Cout      -> [0,...,0,1]   (mask-sum tap)
    # b_ref   : (Cout, 1) float32
    # out_ref : (1, Cout, lane_tile); umask_ref: (1, 1, lane_tile)
    halo = (kh - 1) * w_pad + (kw - 1)
    base = pl.multiple_of(pl.program_id(1) * lane_tile, 128)
    # One 128-aligned dynamic load of the tile window (+halo); the per-tap shifts below
    # are static in-VMEM lane slices (XLU work hidden under the HBM-bound DMA stream).
    win = s_ref[0, :, pl.ds(base, lane_tile + halo)]          # (Cin+1, Lt+halo)

    acc = jnp.zeros((c_out + 1, lane_tile), jnp.float32)
    for tap in range(kh * kw):                                # static unroll (kh*kw taps)
        di, dj = divmod(tap, kw)
        sh = di * w_pad + dj
        panel = win[:, sh:sh + lane_tile]                     # (Cin+1, Lt)
        acc = acc + jnp.dot(w_ref[tap], panel,
                            preferred_element_type=jnp.float32)

    conv = acc[:c_out, :]                     # conv(x*mask, W)        (Cout, Lt)
    msum = acc[c_out:c_out + 1, :]            # conv(mask, ones)       (1, Lt)

    update_mask = jnp.clip(msum, 0.0, 1.0)
    mask_ratio = (slide_winsize / (msum + EPS)) * update_mask   # exact divide

    bias = b_ref[...]                                           # (Cout, 1) f32
    # ((raw - bias) * mask_ratio + bias) * update_mask == (conv*mask_ratio + bias)*update_mask
    out = (conv * mask_ratio + bias) * update_mask
    out = jnp.where(out >= 0.0, out, NEG_SLOPE * out)           # LeakyReLU(0.2)

    out_ref[0] = out.astype(out_ref.dtype)                      # lane-dense stores
    umask_ref[0] = update_mask.astype(umask_ref.dtype)


# ---------------------------------------------------------------------------
# VMEM-budget-aware tiling.
# ---------------------------------------------------------------------------
def _choose_tiles(n, c_in, c_out, kh, kw, w_pad, flat_len, max_tile=8192):
    """Returns (lane_tile, padded flat length, #lane tiles, vmem_limit_bytes)."""
    elt = 4  # float32
    try:
        phys_vmem = int(pltpu.get_tpu_info().vmem_capacity_bytes)
    except Exception:
        phys_vmem = 64 << 20          # assume the smallest recent generation (v7x)
    budget = min(phys_vmem // 2, 48 << 20)

    def footprint(lt):
        l_pad = -(-flat_len // lt) * lt
        m_flat = l_pad + (kh - 1) * w_pad + (kw - 1)
        in_b = 2 * (c_in + 1) * m_flat * elt                   # double-buffered input block
        w_b = 2 * kh * kw * (c_out + 1) * (c_in + 1) * elt     # weights
        io_b = 2 * (c_out + 1) * lt * elt                      # double-buffered outputs
        acc_b = (c_out + 1) * lt * elt                         # f32 accumulator
        return in_b + w_b + io_b + acc_b + (2 << 20)           # + compiler slack

    lane_tile = min(-(-flat_len // 128) * 128, max_tile)       # biggest 128-multiple tile
    while lane_tile > 128 and footprint(lane_tile) > budget:
        lane_tile -= 128
    # TODO(synk): for images whose full (Cin+1, H_pad*W_pad) slab cannot fit VMEM even at
    # lane_tile=128, switch to halo row-tiling with manual make_async_copy double-buffering.

    l_pad = -(-flat_len // lane_tile) * lane_tile
    n_tiles = l_pad // lane_tile
    if n * n_tiles < 2 and lane_tile > 128:                    # feed both v7x TensorCores
        lane_tile = max(128, ((lane_tile // 2 + 127) // 128) * 128)
        l_pad = -(-flat_len // lane_tile) * lane_tile
        n_tiles = l_pad // lane_tile

    vmem_limit = int(min(phys_vmem - (4 << 20),
                         max(32 << 20, footprint(lane_tile) + (4 << 20))))
    return lane_tile, l_pad, n_tiles, vmem_limit


# ---------------------------------------------------------------------------
# Wrapper: cheap O(input) layout plumbing (no im2col), pallas_call, un-flatten.
# ---------------------------------------------------------------------------
def partial_module_forward(x_nchw, mask_nchw, weight_oihw, bias, *, padding):
    n, c_in, h, w = x_nchw.shape
    c_out, _, kh, kw = weight_oihw.shape
    h_out = h + 2 * padding - kh + 1
    w_out = w + 2 * padding - kw + 1
    h_pad = h + 2 * padding
    w_pad = w + 2 * padding
    flat_out = h_out * w_pad          # output positions in padded-width flat coordinates
    dt = x_nchw.dtype

    # Channels fed to the kernel: Cin of x*mask (masking applied exactly once) plus one
    # channel of mask.sum(Cin) (collapses the mask-sum conv to one extra matmul row).
    # TODO(synk): generalize to stride > 1 / dilation > 1 (module defaults are 1/1).
    s = jnp.concatenate([x_nchw * mask_nchw,
                         jnp.sum(mask_nchw, axis=1, keepdims=True)], axis=1)
    s = jnp.pad(s, ((0, 0), (0, 0), (padding, padding), (padding, padding)))

    lane_tile, l_pad, n_tiles, vmem_limit = _choose_tiles(
        n, c_in, c_out, kh, kw, w_pad, flat_out)
    m_flat = l_pad + (kh - 1) * w_pad + (kw - 1)   # flat input length the kernel reads

    s_flat = s.reshape(n, c_in + 1, h_pad * w_pad)
    if m_flat > h_pad * w_pad:                      # zero tail so all tap reads stay in-bounds
        s_flat = jnp.pad(s_flat, ((0, 0), (0, 0), (0, m_flat - h_pad * w_pad)))

    # Per-tap extended weight (taps, Cout+1, Cin+1): conv weight + mask-sum row.
    w_taps = jnp.transpose(weight_oihw, (2, 3, 0, 1)).reshape(kh * kw, c_out, c_in)
    w_top = jnp.concatenate([w_taps, jnp.zeros((kh * kw, c_out, 1), dt)], axis=2)
    w_bot = jnp.concatenate([jnp.zeros((kh * kw, 1, c_in), dt),
                             jnp.ones((kh * kw, 1, 1), dt)], axis=2)
    w_ext = jnp.concatenate([w_top, w_bot], axis=1)
    b2 = bias.reshape(c_out, 1).astype(jnp.float32)

    kernel = functools.partial(
        _partial_conv_kernel, c_out=c_out, kh=kh, kw=kw, w_pad=w_pad,
        lane_tile=lane_tile, slide_winsize=float(c_in * kh * kw))

    out, umask = pl.pallas_call(
        kernel,
        out_shape=(jax.ShapeDtypeStruct((n, c_out, l_pad), dt),
                   jax.ShapeDtypeStruct((n, 1, l_pad), dt)),
        grid_spec=pltpu.PrefetchScalarGridSpec(
            num_scalar_prefetch=0,
            grid=(n, n_tiles),
            in_specs=[
                pl.BlockSpec((1, c_in + 1, m_flat), lambda i, t: (i, 0, 0)),
                pl.BlockSpec((kh * kw, c_out + 1, c_in + 1), lambda i, t: (0, 0, 0)),
                pl.BlockSpec((c_out, 1), lambda i, t: (0, 0)),
            ],
            out_specs=[
                pl.BlockSpec((1, c_out, lane_tile), lambda i, t: (i, 0, t)),
                pl.BlockSpec((1, 1, lane_tile), lambda i, t: (i, 0, t)),
            ]),
        compiler_params=pltpu.CompilerParams(
            dimension_semantics=("parallel", "parallel"),
            vmem_limit_bytes=vmem_limit),
    )(s_flat, w_ext, b2)

    # Padded-width flat -> NCHW: drop the tail pad and the W_pad - w_out garbage columns.
    out = out[:, :, :flat_out].reshape(n, c_out, h_out, w_pad)[..., :w_out]
    # Kernel stores a single mask channel; the Cout broadcast (multi_channel semantics)
    # is left to XLA — consumers needing one channel can skip it entirely.
    umask = umask[:, :, :flat_out].reshape(n, 1, h_out, w_pad)[..., :w_out]
    umask = jnp.broadcast_to(umask, (n, c_out, h_out, w_out))
    return out, umask


# ---------------------------------------------------------------------------
# Parameter setup (glue): spectral normalization of the conv weight (plain JAX).
# ---------------------------------------------------------------------------
def spectral_normalize(weight_oihw, n_iter=30):
    # PyTorch spectral_norm divides the conv weight by its largest singular value,
    # estimated by power iteration on the (Cout, Cin*kh*kw) reshape. Deterministic u init.
    c_out = weight_oihw.shape[0]
    w_mat = weight_oihw.reshape(c_out, -1)
    u = jnp.ones((c_out,), weight_oihw.dtype) / jnp.sqrt(jnp.asarray(c_out, weight_oihw.dtype))
    v = None
    for _ in range(n_iter):
        v = w_mat.T @ u
        v = v / (jnp.linalg.norm(v) + 1e-12)
        u = w_mat @ v
        u = u / (jnp.linalg.norm(u) + 1e-12)
    sigma = u @ (w_mat @ v)
    return weight_oihw / sigma


# ---------------------------------------------------------------------------
# Pure-JAX reference (for correctness check of the kernel).
# ---------------------------------------------------------------------------
def reference_forward(x, mask, weight, bias, *, padding):
    dn = ('NCHW', 'OIHW', 'NCHW')
    pad = [(padding, padding), (padding, padding)]
    ones_w = jnp.ones_like(weight)
    slide_winsize = weight.shape[1] * weight.shape[2] * weight.shape[3]
    um = lax.conv_general_dilated(mask, ones_w, (1, 1), pad, dimension_numbers=dn)
    mask_ratio = slide_winsize / (um + EPS)
    um_c = jnp.clip(um, 0.0, 1.0)
    mask_ratio = mask_ratio * um_c
    raw = lax.conv_general_dilated(x * mask, weight, (1, 1), pad, dimension_numbers=dn)
    raw = raw + bias[None, :, None, None]
    out = (raw - bias[None, :, None, None]) * mask_ratio + bias[None, :, None, None]
    out = out * um_c
    out = jnp.where(out >= 0.0, out, NEG_SLOPE * out)
    return out, um_c


if __name__ == "__main__":
    # Shapes consistent with PartialModule(in_channels=4, out_channels=8, kernel_size=3,
    # padding=1, multi_channel=True, return_mask=True, bias=True).
    N, C_IN, C_OUT, H, W, K, PAD = 2, 4, 8, 16, 16, 3, 1

    key = jax.random.PRNGKey(0)
    k_x, k_m, k_w, k_b = jax.random.split(key, 4)

    x = jax.random.normal(k_x, (N, C_IN, H, W), dtype=jnp.float32)
    # binary hole mask (multi_channel=True -> full NCHW mask)
    mask = (jax.random.uniform(k_m, (N, C_IN, H, W)) > 0.4).astype(jnp.float32)
    weight = jax.random.normal(k_w, (C_OUT, C_IN, K, K), dtype=jnp.float32) * 0.1
    bias = jax.random.normal(k_b, (C_OUT,), dtype=jnp.float32) * 0.1

    weight_sn = spectral_normalize(weight)

    h_out, m_out = partial_module_forward(x, mask, weight_sn, bias, padding=PAD)
    h_out = jax.block_until_ready(h_out)
    m_out = jax.block_until_ready(m_out)

    h_ref, m_ref = reference_forward(x, mask, weight_sn, bias, padding=PAD)

    assert h_out.shape == (N, C_OUT, H, W) and m_out.shape == (N, C_OUT, H, W)
    assert jnp.allclose(h_out, h_ref, atol=1e-4, rtol=1e-4), "feature output mismatch"
    assert jnp.allclose(m_out, m_ref, atol=1e-5, rtol=1e-5), "mask output mismatch"

    print("KERNEL_OK")
</pallas_src>

<mosaic_0001>
module attributes {stable_mosaic.version = 11 : i64} {
  func.func @_partial_conv_kernel(%arg0: i32, %arg1: i32, %arg2: memref<1x5x422xf32, #tpu.memory_space<vmem>>, %arg3: memref<9x9x5xf32, #tpu.memory_space<vmem>>, %arg4: memref<8x1xf32, #tpu.memory_space<vmem>>, %arg5: memref<1x8x384xf32, #tpu.memory_space<vmem>>, %arg6: memref<1x1x384xf32, #tpu.memory_space<vmem>>) attributes {dimension_semantics = [#tpu.dimension_semantics<parallel>, #tpu.dimension_semantics<parallel>], iteration_bounds = array<i64: 2, 1>, scalar_prefetch = 0 : i64, scratch_operands = 0 : i64, tpu.core_type = #tpu.core_type<tc>, window_params = [{transform_indices = @transform_0, window_bounds = array<i64: 1, 5, 422>}, {pipeline_mode = #tpu.pipeline_mode<synchronous>, transform_indices = @transform_1, window_bounds = array<i64: 9, 9, 5>}, {pipeline_mode = #tpu.pipeline_mode<synchronous>, transform_indices = @transform_2, window_bounds = array<i64: 8, 1>}, {transform_indices = @transform_3, window_bounds = array<i64: 1, 8, 384>}, {transform_indices = @transform_4, window_bounds = array<i64: 1, 1, 384>}]} {
    %c384_i32 = arith.constant 384 : i32
    %0 = arith.muli %arg1, %c384_i32 : i32
    %1 = tpu.assume_multiple %0, 128 : i32
    %c0 = arith.constant 0 : index
    %c0_0 = arith.constant 0 : index
    %2 = arith.index_cast %1 : i32 to index
    %3 = vector.load %arg2[%c0, %c0_0, %2] : memref<1x5x422xf32, #tpu.memory_space<vmem>>, vector<1x5x422xf32>
    %4 = vector.shape_cast %3 : vector<1x5x422xf32> to vector<5x422xf32>
    %cst = arith.constant 0.000000e+00 : f32
    %5 = vector.broadcast %cst : f32 to vector<9x384xf32>
    %6 = vector.extract_strided_slice %4 {offsets = [0, 0], sizes = [5, 384], strides = [1, 1]} : vector<5x422xf32> to vector<5x384xf32>
    %c0_1 = arith.constant 0 : index
    %c0_2 = arith.constant 0 : index
    %c0_3 = arith.constant 0 : index
    %7 = vector.load %arg3[%c0_1, %c0_2, %c0_3] : memref<9x9x5xf32, #tpu.memory_space<vmem>>, vector<1x9x5xf32>
    %8 = vector.shape_cast %7 : vector<1x9x5xf32> to vector<9x5xf32>
    %cst_4 = arith.constant dense<0.000000e+00> : vector<9x384xf32>
    %9 = tpu.matmul %8, %6, %cst_4 {dimension_numbers = #tpu.dot_dimension_numbers<[1], [0], [0], [1], [0, 0, 1, 1], [], []>} : vector<9x5xf32>, vector<5x384xf32>, vector<9x384xf32> -> vector<9x384xf32>
    %10 = arith.addf %5, %9 : vector<9x384xf32>
    %11 = vector.extract_strided_slice %4 {offsets = [0, 1], sizes = [5, 384], strides = [1, 1]} : vector<5x422xf32> to vector<5x384xf32>
    %c1 = arith.constant 1 : index
    %c0_5 = arith.constant 0 : index
    %c0_6 = arith.constant 0 : index
    %12 = vector.load %arg3[%c1, %c0_5, %c0_6] : memref<9x9x5xf32, #tpu.memory_space<vmem>>, vector<1x9x5xf32>
    %13 = vector.shape_cast %12 : vector<1x9x5xf32> to vector<9x5xf32>
    %cst_7 = arith.constant dense<0.000000e+00> : vector<9x384xf32>
    %14 = tpu.matmul %13, %11, %cst_7 {dimension_numbers = #tpu.dot_dimension_numbers<[1], [0], [0], [1], [0, 0, 1, 1], [], []>} : vector<9x5xf32>, vector<5x384xf32>, vector<9x384xf32> -> vector<9x384xf32>
    %15 = arith.addf %10, %14 : vector<9x384xf32>
    %16 = vector.extract_strided_slice %4 {offsets = [0, 2], sizes = [5, 384], strides = [1, 1]} : vector<5x422xf32> to vector<5x384xf32>
    %c2 = arith.constant 2 : index
    %c0_8 = arith.constant 0 : index
    %c0_9 = arith.constant 0 : index
    %17 = vector.load %arg3[%c2, %c0_8, %c0_9] : memref<9x9x5xf32, #tpu.memory_space<vmem>>, vector<1x9x5xf32>
    %18 = vector.shape_cast %17 : vector<1x9x5xf32> to vector<9x5xf32>
    %cst_10 = arith.constant dense<0.000000e+00> : vector<9x384xf32>
    %19 = tpu.matmul %18, %16, %cst_10 {dimension_numbers = #tpu.dot_dimension_numbers<[1], [0], [0], [1], [0, 0, 1, 1], [], []>} : vector<9x5xf32>, vector<5x384xf32>, vector<9x384xf32> -> vector<9x384xf32>
    %20 = arith.addf %15, %19 : vector<9x384xf32>
    %21 = vector.extract_strided_slice %4 {offsets = [0, 18], sizes = [5, 384], strides = [1, 1]} : vector<5x422xf32> to vector<5x384xf32>
    %c3 = arith.constant 3 : index
    %c0_11 = arith.constant 0 : index
    %c0_12 = arith.constant 0 : index
    %22 = vector.load %arg3[%c3, %c0_11, %c0_12] : memref<9x9x5xf32, #tpu.memory_space<vmem>>, vector<1x9x5xf32>
    %23 = vector.shape_cast %22 : vector<1x9x5xf32> to vector<9x5xf32>
    %cst_13 = arith.constant dense<0.000000e+00> : vector<9x384xf32>
    %24 = tpu.matmul %23, %21, %cst_13 {dimension_numbers = #tpu.dot_dimension_numbers<[1], [0], [0], [1], [0, 0, 1, 1], [], []>} : vector<9x5xf32>, vector<5x384xf32>, vector<9x384xf32> -> vector<9x384xf32>
    %25 = arith.addf %20, %24 : vector<9x384xf32>
    %26 = vector.extract_strided_slice %4 {offsets = [0, 19], sizes = [5, 384], strides = [1, 1]} : vector<5x422xf32> to vector<5x384xf32>
    %c4 = arith.constant 4 : index
    %c0_14 = arith.constant 0 : index
    %c0_15 = arith.constant 0 : index
    %27 = vector.load %arg3[%c4, %c0_14, %c0_15] : memref<9x9x5xf32, #tpu.memory_space<vmem>>, vector<1x9x5xf32>
    %28 = vector.shape_cast %27 : vector<1x9x5xf32> to vector<9x5xf32>
    %cst_16 = arith.constant dense<0.000000e+00> : vector<9x384xf32>
    %29 = tpu.matmul %28, %26, %cst_16 {dimension_numbers = #tpu.dot_dimension_numbers<[1], [0], [0], [1], [0, 0, 1, 1], [], []>} : vector<9x5xf32>, vector<5x384xf32>, vector<9x384xf32> -> vector<9x384xf32>
    %30 = arith.addf %25, %29 : vector<9x384xf32>
    %31 = vector.extract_strided_slice %4 {offsets = [0, 20], sizes = [5, 384], strides = [1, 1]} : vector<5x422xf32> to vector<5x384xf32>
    %c5 = arith.constant 5 : index
    %c0_17 = arith.constant 0 : index
    %c0_18 = arith.constant 0 : index
    %32 = vector.load %arg3[%c5, %c0_17, %c0_18] : memref<9x9x5xf32, #tpu.memory_space<vmem>>, vector<1x9x5xf32>
    %33 = vector.shape_cast %32 : vector<1x9x5xf32> to vector<9x5xf32>
    %cst_19 = arith.constant dense<0.000000e+00> : vector<9x384xf32>
    %34 = tpu.matmul %33, %31, %cst_19 {dimension_numbers = #tpu.dot_dimension_numbers<[1], [0], [0], [1], [0, 0, 1, 1], [], []>} : vector<9x5xf32>, vector<5x384xf32>, vector<9x384xf32> -> vector<9x384xf32>
    %35 = arith.addf %30, %34 : vector<9x384xf32>
    %36 = vector.extract_strided_slice %4 {offsets = [0, 36], sizes = [5, 384], strides = [1, 1]} : vector<5x422xf32> to vector<5x384xf32>
    %c6 = arith.constant 6 : index
    %c0_20 = arith.constant 0 : index
    %c0_21 = arith.constant 0 : index
    %37 = vector.load %arg3[%c6, %c0_20, %c0_21] : memref<9x9x5xf32, #tpu.memory_space<vmem>>, vector<1x9x5xf32>
    %38 = vector.shape_cast %37 : vector<1x9x5xf32> to vector<9x5xf32>
    %cst_22 = arith.constant dense<0.000000e+00> : vector<9x384xf32>
    %39 = tpu.matmul %38, %36, %cst_22 {dimension_numbers = #tpu.dot_dimension_numbers<[1], [0], [0], [1], [0, 0, 1, 1], [], []>} : vector<9x5xf32>, vector<5x384xf32>, vector<9x384xf32> -> vector<9x384xf32>
    %40 = arith.addf %35, %39 : vector<9x384xf32>
    %41 = vector.extract_strided_slice %4 {offsets = [0, 37], sizes = [5, 384], strides = [1, 1]} : vector<5x422xf32> to vector<5x384xf32>
    %c7 = arith.constant 7 : index
    %c0_23 = arith.constant 0 : index
    %c0_24 = arith.constant 0 : index
    %42 = vector.load %arg3[%c7, %c0_23, %c0_24] : memref<9x9x5xf32, #tpu.memory_space<vmem>>, vector<1x9x5xf32>
    %43 = vector.shape_cast %42 : vector<1x9x5xf32> to vector<9x5xf32>
    %cst_25 = arith.constant dense<0.000000e+00> : vector<9x384xf32>
    %44 = tpu.matmul %43, %41, %cst_25 {dimension_numbers = #tpu.dot_dimension_numbers<[1], [0], [0], [1], [0, 0, 1, 1], [], []>} : vector<9x5xf32>, vector<5x384xf32>, vector<9x384xf32> -> vector<9x384xf32>
    %45 = arith.addf %40, %44 : vector<9x384xf32>
    %46 = vector.extract_strided_slice %4 {offsets = [0, 38], sizes = [5, 384], strides = [1, 1]} : vector<5x422xf32> to vector<5x384xf32>
    %c8 = arith.constant 8 : index
    %c0_26 = arith.constant 0 : index
    %c0_27 = arith.constant 0 : index
    %47 = vector.load %arg3[%c8, %c0_26, %c0_27] : memref<9x9x5xf32, #tpu.memory_space<vmem>>, vector<1x9x5xf32>
    %48 = vector.shape_cast %47 : vector<1x9x5xf32> to vector<9x5xf32>
    %cst_28 = arith.constant dense<0.000000e+00> : vector<9x384xf32>
    %49 = tpu.matmul %48, %46, %cst_28 {dimension_numbers = #tpu.dot_dimension_numbers<[1], [0], [0], [1], [0, 0, 1, 1], [], []>} : vector<9x5xf32>, vector<5x384xf32>, vector<9x384xf32> -> vector<9x384xf32>
    %50 = arith.addf %45, %49 : vector<9x384xf32>
    %51 = vector.extract_strided_slice %50 {offsets = [0, 0], sizes = [8, 384], strides = [1, 1]} : vector<9x384xf32> to vector<8x384xf32>
    %52 = vector.extract_strided_slice %50 {offsets = [8, 0], sizes = [1, 384], strides = [1, 1]} : vector<9x384xf32> to vector<1x384xf32>
    %cst_29 = arith.constant 0.000000e+00 : f32
    %cst_30 = arith.constant 1.000000e+00 : f32
    %53 = vector.broadcast %cst_29 : f32 to vector<1x384xf32>
    %54 = arith.maximumf %53, %52 : vector<1x384xf32>
    %55 = vector.broadcast %cst_30 : f32 to vector<1x384xf32>
    %56 = arith.minimumf %55, %54 : vector<1x384xf32>
    %cst_31 = arith.constant 9.99999993E-9 : f32
    %57 = vector.broadcast %cst_31 : f32 to vector<1x384xf32>
    %58 = arith.addf %52, %57 : vector<1x384xf32>
    %cst_32 = arith.constant 3.600000e+01 : f32
    %59 = vector.broadcast %cst_32 : f32 to vector<1x384xf32>
    %60 = arith.divf %59, %58 : vector<1x384xf32>
    %61 = arith.mulf %60, %56 : vector<1x384xf32>
    %c0_33 = arith.constant 0 : index
    %c0_34 = arith.constant 0 : index
    %62 = vector.load %arg4[%c0_33, %c0_34] : memref<8x1xf32, #tpu.memory_space<vmem>>, vector<8x1xf32>
    %63 = vector.broadcast %61 : vector<1x384xf32> to vector<8x384xf32>
    %64 = arith.mulf %51, %63 : vector<8x384xf32>
    %65 = vector.broadcast %62 : vector<8x1xf32> to vector<8x384xf32>
    %66 = arith.addf %64, %65 : vector<8x384xf32>
    %67 = vector.broadcast %56 : vector<1x384xf32> to vector<8x384xf32>
    %68 = arith.mulf %66, %67 : vector<8x384xf32>
    %cst_35 = arith.constant 0.000000e+00 : f32
    %69 = vector.broadcast %cst_35 : f32 to vector<8x384xf32>
    %70 = arith.cmpf oge, %68, %69 : vector<8x384xf32>
    %cst_36 = arith.constant 2.000000e-01 : f32
    %71 = vector.broadcast %cst_36 : f32 to vector<8x384xf32>
    %72 = arith.mulf %71, %68 : vector<8x384xf32>
    %73 = arith.select %70, %68, %72 : vector<8x384xi1>, vector<8x384xf32>
    %c0_37 = arith.constant 0 : index
    %c0_38 = arith.constant 0 : index
    %c0_39 = arith.constant 0 : index
    %74 = vector.load %arg5[%c0_37, %c0_38, %c0_39] : memref<1x8x384xf32, #tpu.memory_space<vmem>>, vector<1x8x384xf32>
    %75 = vector.shape_cast %74 : vector<1x8x384xf32> to vector<8x384xf32>
    %76 = vector.shape_cast %73 : vector<8x384xf32> to vector<1x8x384xf32>
    tpu.vector_store %arg5[%c0_37, %c0_38, %c0_39], %76 {strides = array<i32>} : memref<1x8x384xf32, #tpu.memory_space<vmem>>, vector<1x8x384xf32>,
    %c0_40 = arith.constant 0 : index
    %c0_41 = arith.constant 0 : index
    %c0_42 = arith.constant 0 : index
    %77 = vector.load %arg6[%c0_40, %c0_41, %c0_42] : memref<1x1x384xf32, #tpu.memory_space<vmem>>, vector<1x1x384xf32>
    %78 = vector.shape_cast %77 : vector<1x1x384xf32> to vector<1x384xf32>
    %79 = vector.shape_cast %56 : vector<1x384xf32> to vector<1x1x384xf32>
    tpu.vector_store %arg6[%c0_40, %c0_41, %c0_42], %79 {strides = array<i32>} : memref<1x1x384xf32, #tpu.memory_space<vmem>>, vector<1x1x384xf32>,
    return
  }
  func.func @transform_0(%arg0: i32, %arg1: i32) -> (i32, i32, i32) {
    %c0_i32 = arith.constant 0 : i32
    %c0_i32_0 = arith.constant 0 : i32
    %c0_i32_1 = arith.constant 0 : i32
    return %arg0, %c0_i32, %c0_i32_0 : i32, i32, i32
  }
  func.func @transform_1(%arg0: i32, %arg1: i32) -> (i32, i32, i32) {
    %c0_i32 = arith.constant 0 : i32
    %c0_i32_0 = arith.constant 0 : i32
    %c0_i32_1 = arith.constant 0 : i32
    %c0_i32_2 = arith.constant 0 : i32
    return %c0_i32, %c0_i32_0, %c0_i32_1 : i32, i32, i32
  }
  func.func @transform_2(%arg0: i32, %arg1: i32) -> (i32, i32) {
    %c0_i32 = arith.constant 0 : i32
    %c0_i32_0 = arith.constant 0 : i32
    %c0_i32_1 = arith.constant 0 : i32
    return %c0_i32, %c0_i32_0 : i32, i32
  }
  func.func @transform_3(%arg0: i32, %arg1: i32) -> (i32, i32, i32) {
    %c0_i32 = arith.constant 0 : i32
    %c0_i32_0 = arith.constant 0 : i32
    return %arg0, %c0_i32, %arg1 : i32, i32, i32
  }
  func.func @transform_4(%arg0: i32, %arg1: i32) -> (i32, i32, i32) {
    %c0_i32 = arith.constant 0 : i32
    %c0_i32_0 = arith.constant 0 : i32
    return %arg0, %c0_i32, %arg1 : i32, i32, i32
  }
}

</mosaic_0001>

<bundles_post_ra>
// kernel: tpu_custom_call.1
= control target key start
LH: loop header
LB: loop body
LE: loop exit
PB: predicated region body
PF: predicated region fallthrough
CT: control target
= control target key end

     0   :  { %10 = vsyncpa [#allocation3], 0  ;;  %s2943_s0 = inlined_call_operand.vmem [shape: f32[2,5,422], index: 0, kind: input, shape index: {}]   ;;  %s2944_s1 = inlined_call_operand.vmem [shape: f32[9,9,5], index: 1, kind: input, shape index: {}]   ;;  %s2945_s2 = inlined_call_operand.vmem [shape: f32[8,1], index: 2, kind: input, shape index: {}]   ;;  %s2946_s3 = inlined_call_operand.hbm [shape: f32[2,8,384], index: 3, kind: output, shape index: {0}]   ;;  %s2947_s4 = inlined_call_operand.hbm [shape: f32[2,1,384], index: 4, kind: output, shape index: {1}]  }
   0x1   :  { %12 = vsyncpa [#allocation3 + $0x1], 0 }
   0x2   :  { %13 = vsyncpa [#allocation5], 0 }
   0x3   :  { %15 = vsyncpa [#allocation5 + $0x1], 0  ;;  %s2569_s15 = smov 0   ;;  %s2571_s16 = smov 0  }
   0x4   :  { %s2573_s17 = smov 0   ;;  %s2575_s18 = smov 0  }
   0x5   :  { %s2577_s19 = smov 0   ;;  %s2579_s20 = smov 0  }
   0x6 LB: > { %s2126_s21 = sadd.s32 4294967295, %s2529_s20   ;;  %s2127_s22 = sadd.s32 4294967294, %s2529_s20   ;;  %s2529_s20 = sphi %s2579_s20, %s21_s20   ;;  %s2525_s19 = sphi %s2577_s19, %s2954_s19   ;;  %s2521_s18 = sphi %s2575_s18, %s2953_s18   ;;  %s2517_s17 = sphi %s2573_s17, %s2952_s17   ;;  %s2513_s16 = sphi %s2571_s16, %s2951_s16   ;;  %s2509_s15 = sphi %s2569_s15, %s2950_s15  }
   0x7   : > { %s33_s23 = sadd.s32 1, %s2525_s19  ;;  %s110_s24 = sadd.s32 1, %s2517_s17 }
   0x8   : > { %p35_p0 = scmp.ge.s32.totalorder %s33_s23, 2  ;;  %p120_p1 = scmp.ne.s32.totalorder %s2517_s17, %s2513_s16 }
   0x9   : > { %p121_p2 = scmp.eq.s32.totalorder %s2126_s21, 1  ;;  %p126_p3 = scmp.ne.s32.totalorder %s2513_s16, %s2509_s15 }
   0xa   : > { %s2956_s23 = smov (%p35_p0, %s33_s23), 0  ;;  %p127_p5 = scmp.eq.s32.totalorder %s2127_s22, 1 }
   0xb   : > { %p2609_p4 = por %p121_p2, %p120_p1  ;;  %s105_s26 = ssub.s32 %s2525_s19, %s2956_s23 }
   0xc   : > { %p2130_p6 = scmp.ge.s32.totalorder %s2529_s20, 1  ;;  %p108_p7 = scmp.eq.s32.totalorder %s105_s26, 0 }
   0xd   : > { %p2616_p8 = por %p127_p5, %p126_p3  ;;  %p187_p9 = scmp.lt.s32.totalorder %s2529_s20, 3 }
   0xe   : > { %s2622_s28 = scalar_select %p108_p7, %s2517_s17, %s110_s24  }
   0xf   : > { %p188_p10 = pnand %p2130_p6, %p187_p9 }
  0x10   : > { %p218_p11 = scmp.lt.s32.totalorder (!%p188_p10), %s2521_s18, 1  ;;  %v2531_v0 = vmov (!%p188_p10), 0.0   ;;  %s2532_s8 = smov (!%p188_p10), 127   ;;  %v1898_v5 = vld [vmem:[%s2945_s2] sm:$0xff] (!%p188_p10)  ;;  %v2540_v6 = vmov (!%p188_p10), 0   ;;  %vm251_vm0 = vcmask (!%p188_p10), 1039360  }
  0x11   : > { %191 = sbr.rel (%p188_p10) target bundleno = 493 (0x1ed), region = 32  ;;  %333 = vmatprep.mubr.f32.mxu1 (!%p188_p10), %v2531_v0  ;;  %676 = vmatprep.mubr.f32.mxu0 (!%p188_p10), %v2531_v0  ;;  %s2533_s9 = smov (!%p188_p10), 126   ;;  %vm262_vm1 = vcmask (!%p188_p10), 1044480   ;;  %v2133_v12 = vld [vmem:[%s2944_s1 + $0x10] sm:$0xff] (!%p188_p10)  ;;  %vm255_vm2 = vcmask (!%p188_p10), 39936   ;;  %vm596_vm3 = vcmask (!%p188_p10), 1031168  }
  0x12   : > { %s2534_s10 = smov (!%p188_p10), 110   ;;  %s2535_s11 = smov (!%p188_p10), 109   ;;  %2412 = vset.pattern.permute.xlu0 (!%p188_p10), %v2540_v6  ;;  %v2134_v17 = vld [vmem:[%s2944_s1 + $0x18] sm:$0x1] (!%p188_p10)  ;;  %v2149_v20 = vld [vmem:[%s2944_s1 + $0x20] sm:$0xff] (!%p188_p10)  ;;  %vm781_vm4 = vcmask (!%p188_p10), 900096  }
  0x13   : > { %s2536_s12 = smov (!%p188_p10), 108   ;;  %s2537_s13 = smov (!%p188_p10), 92   ;;  %v2150_v24 = vld [vmem:[%s2944_s1 + $0x28] sm:$0x1] (!%p188_p10)  ;;  %v234_v27 = vld [vmem:[%s2944_s1] sm:$0xff] (!%p188_p10)  ;;  %v2158_v30 = vld [vmem:[%s2944_s1 + $0x30] sm:$0xff] (!%p188_p10) }
  0x14   : > { %s2538_s14 = smov (!%p188_p10), 91   ;;  %s2539_s21 = smov (!%p188_p10), 90   ;;  %v235_v33 = vld [vmem:[%s2944_s1 + $0x8] sm:$0x1] (!%p188_p10)  ;;  %vm966_vm5 = vcmask (!%p188_p10), 891904   ;;  %v2167_v40 = vld [vmem:[%s2944_s1 + $0x40] sm:$0xff] (!%p188_p10) }
  0x15   : > { %v2159_v35 = vld [vmem:[%s2944_s1 + $0x38] sm:$0x1] (!%p188_p10)  ;;  %vm1151_vm6 = vcmask (!%p188_p10), 883712   ;;  %v2168_v44 = vld [vmem:[%s2944_s1 + $0x48] sm:$0x1] (!%p188_p10)  ;;  %v2176_v49 = vld [vmem:[%s2944_s1 + $0x50] sm:$0xff] (!%p188_p10) }
  0x16   : > { %vm1336_vm7 = vcmask (!%p188_p10), 752640   ;;  %v2177_v53 = vld [vmem:[%s2944_s1 + $0x58] sm:$0x1] (!%p188_p10)  ;;  %v2185_v58 = vld [vmem:[%s2944_s1 + $0x60] sm:$0xff] (!%p188_p10)  ;;  %vm1521_vm8 = vcmask (!%p188_p10), 744448   ;;  %vm1706_vm9 = vcmask (!%p188_p10), 736256  }
  0x17   : > { %v2186_v62 = vld [vmem:[%s2944_s1 + $0x68] sm:$0x1] (!%p188_p10)  ;;  %s2832_s6 = sand.u32 (!%p188_p10), 1, %s2513_s16   ;;  %s2542_s24 = smov (!%p188_p10), [#allocation4]  }
  0x18   : > { %s219_s29 = scalar_select %p218_p11, %s2521_s18, 1 }
  0x19   : > { %s2423_s26 = sshll.u32 %s2542_s24, 4  ;;  %s2424_s26 = int_to_ptr.vmem [resolvable:$false] %s2423_s26 }
  0x1a   : > { %s2216_s30 = sshll.u32 %s219_s29, 5  ;;  %s2425_s29 = scalar_lea.vmem %s2424_s26, 96 }
  0x1b   : > { %s222_s7 = scalar_lea.vmem %s2943_s0, %s2216_s30 }
  0x1c   : > { %v2631_v1 = vld [vmem:[%s222_s7 + $0x8] sm:$0x1f]  ;;  %v2633_v2 = vld [vmem:[%s222_s7] sm:$0x1f]  ;;  %v2637_v3 = vld [vmem:[%s222_s7 + $0x10] sm:$0x1f] }
  0x1d   : > { %245 = vrot.lane.b32.xlu0 %v2631_v1, %s2532_s8  ;;  %243 = vrot.lane.b32.xlu1 %v2633_v2, %s2532_s8  ;;  %v233_v4 = vld [vmem:[%s222_s7 + $0x18] sm:$0x1f]  ;;  %s2338_s7 = smul.u32 3, %s2832_s6 }
  0x21   : > { %247 = vrot.lane.b32.xlu0 %v2637_v3, %s2532_s8  ;;  %249 = vrot.lane.b32.xlu1 %v233_v4, %s2532_s8  ;;  %s2340_s8 = smul.u32 48, %s2521_s18 }
  0x25   : > { %590 = vrot.lane.b32.xlu0 %v2631_v1, %s2533_s9  ;;  %592 = vrot.lane.b32.xlu1 %v2637_v3, %s2533_s9 }
  0x29   : > { %588 = vrot.lane.b32.xlu0 %v2633_v2, %s2533_s9  ;;  %594 = vrot.lane.b32.xlu1 %v233_v4, %s2533_s9  ;;  %s217_s9 = scalar_lea.vmem [#allocation4], %s2338_s7 }
  0x2d   : > { %775 = vrot.lane.b32.xlu0 %v2631_v1, %s2534_s10  ;;  %777 = vrot.lane.b32.xlu1 %v2637_v3, %s2534_s10 }
  0x31   : > { %773 = vrot.lane.b32.xlu0 %v2633_v2, %s2534_s10  ;;  %779 = vrot.lane.b32.xlu1 %v233_v4, %s2534_s10  ;;  %s2019_s10 = sshll.u32 %s217_s9, 4  ;;  %s2857_s10 = int_to_ptr.vmem [resolvable:$true] %s2019_s10 }
  0x32   : > { %s2419_s22 = scalar_lea.vmem %s2857_s10, 48  ;;  %p2426_p1 = scmp.lt.s32.totalorder %s2857_s10, %s2424_s26 }
  0x33   : > { %p2420_p12 = scmp.ne.s32.totalorder %s2857_s10, %s2419_s22  ;;  %p2427_p2 = scmp.lt.s32.totalorder %s2425_s29, %s2419_s22 }
  0x35   : > { %960 = vrot.lane.b32.xlu0 %v2631_v1, %s2535_s11  ;;  %962 = vrot.lane.b32.xlu1 %v2637_v3, %s2535_s11  ;;  %p2421_p13 = pnand %p2420_p12, %p2609_p4  ;;  %p2428_p3 = por %p2427_p2, %p2426_p1 }
  0x37   : > { %p2422_p0 = pneg %p2421_p13 }
  0x39   : > { %958 = vrot.lane.b32.xlu0 %v2633_v2, %s2535_s11  ;;  %964 = vrot.lane.b32.xlu1 %v233_v4, %s2535_s11  ;;  %s2337_s11 = smul.u32 24, %s2832_s6  ;;  %p2429_p5 = pnand %p2428_p3, %p2422_p0 }
  0x3d   : > { %1145 = vrot.lane.b32.xlu0 %v2631_v1, %s2536_s12  ;;  %1147 = vrot.lane.b32.xlu1 %v2637_v3, %s2536_s12 }
  0x41   : > { %1143 = vrot.lane.b32.xlu0 %v2633_v2, %s2536_s12  ;;  %1149 = vrot.lane.b32.xlu1 %v233_v4, %s2536_s12 }
  0x45   : > { %1330 = vrot.lane.b32.xlu0 %v2631_v1, %s2537_s13  ;;  %1332 = vrot.lane.b32.xlu1 %v2637_v3, %s2537_s13 }
  0x49   : > { %1328 = vrot.lane.b32.xlu0 %v2633_v2, %s2537_s13  ;;  %1334 = vrot.lane.b32.xlu1 %v233_v4, %s2537_s13 }
  0x4d   : > { %1515 = vrot.lane.b32.xlu0 %v2631_v1, %s2538_s14  ;;  %1517 = vrot.lane.b32.xlu1 %v2637_v3, %s2538_s14 }
  0x51   : > { %1513 = vrot.lane.b32.xlu0 %v2633_v2, %s2538_s14  ;;  %1519 = vrot.lane.b32.xlu1 %v233_v4, %s2538_s14  ;;  %s2855_s14 = scalar_lea.hbm %s2947_s4, %s2340_s8 }
  0x55   : > { %1700 = vrot.lane.b32.xlu0 %v2631_v1, %s2539_s21  ;;  %1702 = vrot.lane.b32.xlu1 %v2637_v3, %s2539_s21 }
  0x59   : > { %1698 = vrot.lane.b32.xlu0 %v2633_v2, %s2539_s21  ;;  %1704 = vrot.lane.b32.xlu1 %v233_v4, %s2539_s21  ;;  %v2194_v4 = vld [vmem:[%s2944_s1 + $0x70] sm:$0xff]  ;;  %s1987_s21 = scalar_lea.sflag [#allocation5], %s2832_s6 }
  0x5d   : > { %1916 = vperm.xlu0 %2412, %v1898_v5  }
  0x8f   : > { %v246_v7 = vpop.permute.xlu0 %245  ;;  %v244_v8 = vpop.permute.xlu1 %243 }
  0x90   : > { %v252_v13 = vsel %vm251_vm0, %v244_v8, %v246_v7  ;;  %v2195_v8 = vld [vmem:[%s2944_s1 + $0x78] sm:$0x1] }
  0x93   : > { %v248_v9 = vpop.permute.xlu0 %247  ;;  %v250_v10 = vpop.permute.xlu1 %249 }
  0x94   : > { %v253_v11 = vsel %vm251_vm0, %v246_v7, %v248_v9  ;;  %v254_v14 = vsel %vm251_vm0, %v248_v9, %v250_v10 }
  0x95   : > { %2135 = vmatprep.subr.msk.mxu1 %vm262_vm1, %v253_v11 }
  0x96   : > { %2136 = vmatpush1.msk.msra.mxu1 %vm262_vm1, %v252_v13  ;;  %v2203_v13 = vld [vmem:[%s2944_s1 + $0x80] sm:$0xff] }
  0x97   : > { %v591_v15 = vpop.permute.xlu0 %590  ;;  %2137 = vmatmul.mubr.msk.f32.vlgmr.msra.gmra.mrb[0].mxu1 %vm255_vm2, %v2133_v12  ;;  %2244 = vmatprep.subr.msk.mxu1 %vm262_vm1, %v254_v14  ;;  %v593_v16 = vpop.permute.xlu1 %592 }
  0x98   : > { %2245 = vmatpush3.msk.msra.mxu1 %vm262_vm1, %v254_v14  ;;  %339 = vmatprep.mubr.f32.mxu1 %v2531_v0  ;;  %v598_v18 = vsel %vm596_vm3, %v591_v15, %v593_v16 }
  0x99   : > { %2151 = vmatprep.subr.msk.mxu0 %vm262_vm1, %v598_v18  ;;  %2142 = vmatprep.subr.msk.mxu1 %vm262_vm1, %v2631_v1 }
  0x9b   : > { %v589_v19 = vpop.permute.xlu0 %588  ;;  %2138 = vmatmul.mubr.msk.f32.gmra.mrb[2].mxu1 %vm255_vm2, %v2134_v17  ;;  %v595_v21 = vpop.permute.xlu1 %594 }
  0x9c   : > { %v597_v22 = vsel %vm596_vm3, %v589_v19, %v591_v15  ;;  %2246 = vmatprep.mubr.msk.f32.mxu1 %vm255_vm2, %v2133_v12  ;;  %v599_v28 = vsel %vm596_vm3, %v593_v16, %v595_v21  ;;  %v2204_v15 = vld [vmem:[%s2944_s1 + $0x88] sm:$0x1] }
  0x9d   : > { %2152 = vmatpush1.msk.msra.mxu0 %vm262_vm1, %v597_v22 }
  0x9e   : > { %2153 = vmatmul.mubr.msk.f32.vlgmr.msra.gmra.mrb[0].mxu0 %vm255_vm2, %v2149_v20 }
  0x9f   : > { %v776_v23 = vpop.permute.xlu0 %775  ;;  %2247 = vmatmul.mubr.msk.f32.vlgmr.msra.gmra.mrb[4].mxu1 %vm255_vm2, %v2134_v17  ;;  %682 = vmatprep.mubr.f32.mxu0 %v2531_v0  ;;  %v778_v25 = vpop.permute.xlu1 %777 }
  0xa0   : > { %2143 = vmatpush1.msk.msra.mxu1 %vm262_vm1, %v2633_v2  ;;  %497 = vmatprep.mubr.f32.mxu1 %v2531_v0  ;;  %v783_v26 = vsel %vm781_vm4, %v776_v23, %v778_v25 }
  0xa1   : > { %2249 = vmatprep.subr.msk.mxu1 %vm262_vm1, %v2637_v3  ;;  %2160 = vmatprep.subr.msk.mxu0 %vm262_vm1, %v783_v26 }
  0xa2   : > { %2154 = vmatmul.mubr.msk.f32.gmra.mrb[2].mxu0 %vm255_vm2, %v2150_v24 }
  0xa3   : > { %v774_v29 = vpop.permute.xlu0 %773  ;;  %2144 = vmatmul.mubr.msk.f32.vlgmr.msra.gmra.mrb[0].mxu1 %vm255_vm2, %v234_v27  ;;  %861 = vmatprep.mubr.f32.mxu0 %v2531_v0  ;;  %v780_v31 = vpop.permute.xlu1 %779 }
  0xa4   : > { %v782_v32 = vsel %vm781_vm4, %v774_v29, %v776_v23  ;;  %2250 = vmatpush3.msk.msra.mxu1 %vm262_vm1, %v2637_v3  ;;  %503 = vmatprep.mubr.f32.mxu1 %v2531_v0  ;;  %v784_v38 = vsel %vm781_vm4, %v778_v25, %v780_v31 }
  0xa5   : > { %2254 = vmatprep.subr.msk.mxu1 %vm262_vm1, %v599_v28  ;;  %2161 = vmatpush1.msk.msra.mxu0 %vm262_vm1, %v782_v32 }
  0xa6   : > { %2162 = vmatmul.mubr.msk.f32.vlgmr.msra.gmra.mrb[0].mxu0 %vm255_vm2, %v2158_v30 }
  0xa7   : > { %v961_v34 = vpop.permute.xlu0 %960  ;;  %2145 = vmatmul.mubr.msk.f32.gmra.mrb[2].mxu1 %vm255_vm2, %v235_v33  ;;  %867 = vmatprep.mubr.f32.mxu0 %v2531_v0  ;;  %v963_v36 = vpop.permute.xlu1 %962 }
  0xa8   : > { %2251 = vmatprep.mubr.msk.f32.mxu1 %vm255_vm2, %v234_v27  ;;  %v968_v37 = vsel %vm966_vm5, %v961_v34, %v963_v36 }
  0xa9   : > { %2169 = vmatprep.subr.msk.mxu0 %vm262_vm1, %v968_v37  ;;  %v2541_v37 = vmov 1966171168  }
  0xaa   : > { %2163 = vmatmul.mubr.msk.f32.gmra.mrb[2].mxu0 %vm255_vm2, %v2159_v35 }
  0xab   : > { %v959_v39 = vpop.permute.xlu0 %958  ;;  %2252 = vmatmul.mubr.msk.f32.vlgmr.msra.gmra.mrb[4].mxu1 %vm255_vm2, %v235_v33  ;;  %1046 = vmatprep.mubr.f32.mxu0 %v2531_v0  ;;  %v965_v41 = vpop.permute.xlu1 %964 }
  0xac   : > { %v967_v42 = vsel %vm966_vm5, %v959_v39, %v961_v34  ;;  %2255 = vmatpush3.msk.msra.mxu1 %vm262_vm1, %v599_v28  ;;  %2256 = vmatprep.mubr.msk.f32.mxu1 %vm255_vm2, %v2149_v20  ;;  %v969_v47 = vsel %vm966_vm5, %v963_v36, %v965_v41  ;;  %v1899_v36 = vlaneseq }
  0xad   : > { %2259 = vmatprep.subr.msk.mxu1 %vm262_vm1, %v784_v38  ;;  %2170 = vmatpush1.msk.msra.mxu0 %vm262_vm1, %v967_v42 }
  0xae   : > { %2171 = vmatmul.mubr.msk.f32.vlgmr.msra.gmra.mrb[0].mxu0 %vm255_vm2, %v2167_v40  ;;  %v1900_v39 = vshrl.u32 %v1899_v36, 7  ;;  %vm1978_vm10 = vcmp.lt.s32.totalorder %v1899_v36, 384 }
  0xaf   : > { %v1146_v43 = vpop.permute.xlu0 %1145  ;;  %1052 = vmatprep.mubr.f32.mxu0 %v2531_v0  ;;  %v1148_v45 = vpop.permute.xlu1 %1147 }
  0xb0   : > { %v1153_v46 = vsel %vm1151_vm6, %v1146_v43, %v1148_v45 }
  0xb1   : > { %2178 = vmatprep.subr.msk.mxu0 %vm262_vm1, %v1153_v46 }
  0xb2   : > { %2172 = vmatmul.mubr.msk.f32.gmra.mrb[2].mxu0 %vm255_vm2, %v2168_v44 }
  0xb3   : > { %v1144_v48 = vpop.permute.xlu0 %1143  ;;  %2257 = vmatmul.mubr.msk.f32.vlgmr.msra.gmra.mrb[4].mxu1 %vm255_vm2, %v2150_v24  ;;  %1231 = vmatprep.mubr.f32.mxu0 %v2531_v0  ;;  %v1150_v50 = vpop.permute.xlu1 %1149 }
  0xb4   : > { %v1152_v51 = vsel %vm1151_vm6, %v1144_v48, %v1146_v43  ;;  %2260 = vmatpush3.msk.msra.mxu1 %vm262_vm1, %v784_v38  ;;  %2261 = vmatprep.mubr.msk.f32.mxu1 %vm255_vm2, %v2158_v30  ;;  %v1154_v56 = vsel %vm1151_vm6, %v1148_v45, %v1150_v50  ;;  %v1954_v38 = vunpack.c.l.s4 %v2541_v37  ;;  %v2834_v45 = vsub.s32 0, %v1900_v39 }
  0xb5   : > { %2264 = vmatprep.subr.msk.mxu1 %vm262_vm1, %v969_v47  ;;  %2179 = vmatpush1.msk.msra.mxu0 %vm262_vm1, %v1152_v51 }
  0xb6   : > { %2180 = vmatmul.mubr.msk.f32.vlgmr.msra.gmra.mrb[0].mxu0 %vm255_vm2, %v2176_v49 }
  0xb7   : > { %v1331_v52 = vpop.permute.xlu0 %1330  ;;  %1237 = vmatprep.mubr.f32.mxu0 %v2531_v0  ;;  %v1333_v54 = vpop.permute.xlu1 %1332 }
  0xb8   : > { %v1338_v55 = vsel %vm1336_vm7, %v1331_v52, %v1333_v54 }
  0xb9   : > { %2187 = vmatprep.subr.msk.mxu0 %vm262_vm1, %v1338_v55 }
  0xba   : > { %2181 = vmatmul.mubr.msk.f32.gmra.mrb[2].mxu0 %vm255_vm2, %v2177_v53 }
  0xbb   : > { %v1329_v57 = vpop.permute.xlu0 %1328  ;;  %2262 = vmatmul.mubr.msk.f32.vlgmr.msra.gmra.mrb[4].mxu1 %vm255_vm2, %v2159_v35  ;;  %1416 = vmatprep.mubr.f32.mxu0 %v2531_v0  ;;  %v1335_v59 = vpop.permute.xlu1 %1334 }
  0xbc   : > { %v1337_v60 = vsel %vm1336_vm7, %v1329_v57, %v1331_v52  ;;  %2265 = vmatpush3.msk.msra.mxu1 %vm262_vm1, %v969_v47  ;;  %2266 = vmatprep.mubr.msk.f32.mxu1 %vm255_vm2, %v2167_v40  ;;  %v1339_v2 = vsel %vm1336_vm7, %v1333_v54, %v1335_v59  ;;  %v1955_v40 = vunpack.c.0.s8 %v1954_v38 }
  0xbd   : > { %2269 = vmatprep.subr.msk.mxu1 %vm262_vm1, %v1154_v56  ;;  %2188 = vmatpush1.msk.msra.mxu0 %vm262_vm1, %v1337_v60 }
  0xbe   : > { %2189 = vmatmul.mubr.msk.f32.vlgmr.msra.gmra.mrb[0].mxu0 %vm255_vm2, %v2185_v58  ;;  %v1958_v48 = vsub.s32 %v1955_v40, %v1900_v39 }
  0xbf   : > { %v1516_v61 = vpop.permute.xlu0 %1515  ;;  %1422 = vmatprep.mubr.f32.mxu0 %v2531_v0  ;;  %v1518_v63 = vpop.permute.xlu1 %1517 }
  0xc0   : > { %v1523_v1 = vsel %vm1521_vm8, %v1516_v61, %v1518_v63 }
  0xc1   : > { %2196 = vmatprep.subr.msk.mxu0 %vm262_vm1, %v1523_v1 }
  0xc2   : > { %2190 = vmatmul.mubr.msk.f32.gmra.mrb[2].mxu0 %vm255_vm2, %v2186_v62 }
  0xc3   : > { %v1514_v3 = vpop.permute.xlu0 %1513  ;;  %2267 = vmatmul.mubr.msk.f32.vlgmr.msra.gmra.mrb[4].mxu1 %vm255_vm2, %v2168_v44  ;;  %1601 = vmatprep.mubr.f32.mxu0 %v2531_v0  ;;  %v1520_v5 = vpop.permute.xlu1 %1519 }
  0xc4   : > { %v1522_v6 = vsel %vm1521_vm8, %v1514_v3, %v1516_v61  ;;  %2270 = vmatpush3.msk.msra.mxu1 %vm262_vm1, %v1154_v56  ;;  %2271 = vmatprep.mubr.msk.f32.mxu1 %vm255_vm2, %v2176_v49  ;;  %v1524_v11 = vsel %vm1521_vm8, %v1518_v63, %v1520_v5 }
  0xc5   : > { %2274 = vmatprep.subr.msk.mxu1 %vm262_vm1, %v1339_v2  ;;  %2197 = vmatpush1.msk.msra.mxu0 %vm262_vm1, %v1522_v6 }
  0xc6   : > { %2198 = vmatmul.mubr.msk.f32.vlgmr.msra.gmra.mrb[0].mxu0 %vm255_vm2, %v2194_v4 }
  0xc7   : > { %v1701_v7 = vpop.permute.xlu0 %1700  ;;  %1607 = vmatprep.mubr.f32.mxu0 %v2531_v0  ;;  %v1703_v9 = vpop.permute.xlu1 %1702 }
  0xc8   : > { %v1708_v10 = vsel %vm1706_vm9, %v1701_v7, %v1703_v9 }
  0xc9   : > { %2205 = vmatprep.subr.msk.mxu0 %vm262_vm1, %v1708_v10 }
  0xca   : > { %2199 = vmatmul.mubr.msk.f32.gmra.mrb[2].mxu0 %vm255_vm2, %v2195_v8 }
  0xcb   : > { %v1699_v12 = vpop.permute.xlu0 %1698  ;;  %2272 = vmatmul.mubr.msk.f32.vlgmr.msra.gmra.mrb[4].mxu1 %vm255_vm2, %v2177_v53  ;;  %1786 = vmatprep.mubr.f32.mxu0 %v2531_v0  ;;  %v1705_v16 = vpop.permute.xlu1 %1704 }
  0xcc   : > { %v1707_v14 = vsel %vm1706_vm9, %v1699_v12, %v1701_v7  ;;  %2275 = vmatpush3.msk.msra.mxu1 %vm262_vm1, %v1339_v2  ;;  %2276 = vmatprep.mubr.msk.f32.mxu1 %vm255_vm2, %v2185_v58  ;;  %v1709_v17 = vsel %vm1706_vm9, %v1703_v9, %v1705_v16 }
  0xcd   : > { %2279 = vmatprep.subr.msk.mxu1 %vm262_vm1, %v1524_v11  ;;  %2206 = vmatpush1.msk.msra.mxu0 %vm262_vm1, %v1707_v14 }
  0xce   : > { %2207 = vmatmul.mubr.msk.f32.vlgmr.msra.gmra.mrb[0].mxu0 %vm255_vm2, %v2203_v13 }
  0xcf   : > { %1792 = vmatprep.mubr.f32.mxu0 %v2531_v0 }
  0xd2   : > { %2208 = vmatmul.mubr.msk.f32.gmra.mrb[2].mxu0 %vm255_vm2, %v2204_v15 }
  0xd3   : > { %2277 = vmatmul.mubr.msk.f32.vlgmr.msra.gmra.mrb[4].mxu1 %vm255_vm2, %v2186_v62 }
  0xd4   : > { %2280 = vmatpush3.msk.msra.mxu1 %vm262_vm1, %v1524_v11  ;;  %2281 = vmatprep.mubr.msk.f32.mxu1 %vm255_vm2, %v2194_v4 }
  0xd5   : > { %2284 = vmatprep.subr.msk.mxu1 %vm262_vm1, %v1709_v17 }
  0xdb   : > { %2282 = vmatmul.mubr.msk.f32.vlgmr.msra.gmra.mrb[4].mxu1 %vm255_vm2, %v2195_v8 }
  0xdc   : > { %2285 = vmatpush3.msk.msra.mxu1 %vm262_vm1, %v1709_v17  ;;  %2286 = vmatprep.mubr.msk.f32.mxu1 %vm255_vm2, %v2203_v13  ;;  %v2842_v55 = vpop.permute.xlu0 %1916 }
  0xe3   : > { %2287 = vmatmul.mubr.msk.f32.vlgmr.msra.gmra.mrb[4].mxu1 %vm255_vm2, %v2204_v15 }
 0x176   : > { %v499_v0 = vpop.f32.mrb[0].mxu1 }
 0x177   : > { %v501_v18 = vpop.f32.mrb[1].mxu1 }
 0x17a   : > { %v505_v19 = vpop.f32.mrb[2].mxu1 }
 0x17b   : > { %v507_v20 = vpop.f32.mrb[3].mxu1 }
 0x1a1   : > { %v1788_v21 = vpop.f32.mrb[0].mxu0 }
 0x1a2   : > { %v2289_v22 = vadd.f32 %v1788_v21, %v499_v0  ;;  %v1790_v23 = vpop.f32.mrb[1].mxu0 }
 0x1a3   : > { %v2290_v24 = vadd.f32 %v1790_v23, %v501_v18 }
 0x1a5   : > { %v1794_v25 = vpop.f32.mrb[2].mxu0 }
 0x1a6   : > { %v2291_v26 = vadd.f32 %v1794_v25, %v505_v19  ;;  %v1796_v27 = vpop.f32.mrb[3].mxu0 }
 0x1a7   : > { %v2292_v28 = vadd.f32 %v1796_v27, %v507_v20 }
 0x1a8   : > { %v1880_v29 = vmax.f32 %v2291_v26, 0.0  ;;  %v1886_v30 = vadd.f32 1e-08, %v2291_v26 }
 0x1a9   : > { %v1881_v31 = vmax.f32 %v2292_v28, 0.0  ;;  %v1887_v32 = vadd.f32 1e-08, %v2292_v28 }
 0x1aa   : > { %v1883_v33 = vmin.f32 %v1880_v29, 1.0  ;;  %2413 = vrcp.f32 %v1886_v30 }
 0x1ab   : > { %v1884_v34 = vmin.f32 %v1881_v31, 1.0  ;;  %2415 = vrcp.f32 %v1887_v32 }
 0x1ac   : > { %v1925_v63 = vrot.slane %v1883_v33, %v2834_v45 }
 0x1ad   : > { %v1952_v35 = vcombine.low %v1883_v33, %v1884_v34  ;;  %v1929_v2 = vrot.slane %v1884_v34, %v2834_v45 }
 0x1af   : > { %v1959_v57 = vrot.slane %v1952_v35, %v1958_v48 }
 0x1b4   : > { %v2414_v41 = vpop.eup %2413 }
 0x1b5   : > { %v2416_v42 = vpop.eup %2415  ;;  %v1890_v43 = vmul.f32 36.0, %v2414_v41 }
 0x1b6   : > { %v1892_v44 = vmul.f32 36.0, %v2416_v42  ;;  %v2288_v46 = vpop.f32.mrb[4].mxu1 }
 0x1b7   : > { %v1895_v47 = vmul.f32 %v1890_v43, %v1883_v33  ;;  %v1882_v49 = vmax.f32 %v2288_v46, 0.0  ;;  %v1888_v50 = vadd.f32 1e-08, %v2288_v46  ;;  %v2836_v51 = vpop.f32.mrb[5].mxu1 }
 0x1b8   : > { %v1896_v52 = vmul.f32 %v1892_v44, %v1884_v34 }
 0x1b9   : > { %v2839_v53 = vmin.f32 %v1882_v49, 1.0  ;;  %2417 = vrcp.f32 %v1888_v50  ;;  %v1902_v54 = vrot.slane %v1895_v47, %v2834_v45 }
 0x1ba   : > { %v1906_v56 = vrot.slane %v1896_v52, %v2834_v45 }
 0x1bb   : > { %v1966_v58 = vrot.slane %v2839_v53, %v1958_v48  ;;  %v1911_v59 = vmul.f32 %v2289_v22, %v1902_v54 }
 0x1bc   : > { %v1912_v60 = vmul.f32 %v2290_v24, %v1906_v56 }
 0x1bd   : > { %v1967_v61 = vcombine.low %v1959_v57, %v1966_v58  ;;  %v1919_v62 = vadd.f32 %v2842_v55, %v1911_v59 }
 0x1be   : > { %v1920_v1 = vadd.f32 %v2842_v55, %v1912_v60 }
 0x1bf   : > { %v1934_v3 = vmul.f32 %v1925_v63, %v1919_v62  ;;  %v1974_v4 = vrot.slane %v1967_v61, %v1958_v48 }
 0x1c0   : > { %v1935_v5 = vmul.f32 %v1929_v2, %v1920_v1 }
 0x1c1   : > { %vm1937_vm11 = vcmp.ge.f32.partialorder %v1934_v3, 0.0  ;;  %v1940_v6 = vmul.f32 0.2, %v1934_v3  ;;  %1980 = vst.msk [vmem:[%s217_s9] sm:$0x7] %vm1978_vm10, %v1974_v4 }
 0x1c2   : > { %vm1938_vm12 = vcmp.ge.f32.partialorder %v1935_v5, 0.0  ;;  %v1941_v7 = vmul.f32 0.2, %v1935_v5 }
 0x1c3   : > { %2432 = shalt.err (!%p2429_p5)
}
 0x1c4   : > { %s2433_s30 = scalar_lea.hbm %s2855_s14, 48  ;;  %s2437_s8 = scalar_lea.hbm %s2947_s4, 96 }
 0x1c5   : > { %p2434_p6 = scmp.ne.s32.totalorder %s2855_s14, %s2433_s30  ;;  %p2438_p10 = scmp.lt.u32.totalorder %s2855_s14, %s2947_s4 }
 0x1c6   : > { %p2439_p11 = scmp.lt.u32.totalorder %s2437_s8, %s2433_s30  ;;  %p2441_p13 = scmp.lt.u32.totalorder %s2433_s30, %s2855_s14 }
 0x1c7   : > { %p2435_p7 = pnand %p2434_p6, %p2609_p4 }
 0x1c8   : > { %p2440_p12 = por %p2439_p11, %p2438_p10 }
 0x1c9   : > { %p2436_p9 = pneg %p2435_p7 }
 0x1ca   : > { %p2442_p0 = por %p2441_p13, %p2440_p12 }
 0x1cc   : > { %p2443_p1 = pnand %p2442_p0, %p2436_p9 }
 0x1ce   : > { %2446 = shalt.err (!%p2443_p1)
}
 0x1cf   : > { %2342 = dma.vmem_to_hbm [thread:$0]  (%p2609_p4), %s2857_s10, 48, %s2855_s14, %s1987_s21   ;;  %v2418_v8 = vpop.eup %2417  ;;  %v1943_v9 = vsel %vm1937_vm11, %v1934_v3, %v1940_v6  ;;  %v1944_v11 = vsel %vm1938_vm12, %v1935_v5, %v1941_v7  ;;  %v1933_v16 = vrot.slane %v2839_v53, %v2834_v45 }
 0x1d0   : > { %v1894_v10 = vmul.f32 36.0, %v2418_v8  ;;  %s210_s13 = scalar_lea.vmem [#allocation2], %s2337_s11  ;;  %s2339_s10 = smul.u32 384, %s2521_s18 }
 0x1d1   : > { %1946 = vst [vmem:[%s210_s13] sm:$0xff] %v1943_v9  ;;  %1947 = vst [vmem:[%s210_s13 + $0x8] sm:$0xff] %v1944_v11  ;;  %s2003_s14 = sshll.u32 %s210_s13, 4  ;;  %s1982_s24 = scalar_lea.sflag [#allocation3], %s2832_s6  ;;  %s2897_s14 = int_to_ptr.vmem [resolvable:$true] %s2003_s14 }
 0x1d2   : > { %v1897_v12 = vmul.f32 %v1894_v10, %v2839_v53  ;;  %s2895_s22 = scalar_lea.hbm %s2946_s3, %s2339_s10  ;;  %s2447_s26 = scalar_lea.vmem %s2897_s14, 384 }
 0x1d3   : > { %p2448_p2 = scmp.ne.s32.totalorder %s2897_s14, %s2447_s26  ;;  %s2543_s18 = smov [#allocation2]  }
 0x1d4   : > { %v1910_v13 = vrot.slane %v1897_v12, %v2834_v45  ;;  %s2451_s29 = sshll.u32 %s2543_s18, 4  ;;  %s2452_s29 = int_to_ptr.vmem [resolvable:$false] %s2451_s29 }
 0x1d5   : > { %p2449_p3 = pnand %p2448_p2, %p2609_p4  ;;  %s2453_s30 = scalar_lea.vmem %s2452_s29, 768 }
 0x1d6   : > { %v1913_v14 = vmul.f32 %v1910_v13, %v2836_v51  ;;  %p2454_p6 = scmp.lt.s32.totalorder %s2897_s14, %s2452_s29  ;;  %p2455_p7 = scmp.lt.s32.totalorder %s2453_s30, %s2447_s26 }
 0x1d7   : > { %p2450_p5 = pneg %p2449_p3 }
 0x1d8   : > { %v1921_v15 = vadd.f32 %v2842_v55, %v1913_v14  ;;  %p2456_p9 = por %p2455_p7, %p2454_p6 }
 0x1da   : > { %v1936_v17 = vmul.f32 %v1933_v16, %v1921_v15  ;;  %p2457_p10 = pnand %p2456_p9, %p2450_p5 }
 0x1dc   : > { %vm1939_vm13 = vcmp.ge.f32.partialorder %v1936_v17, 0.0  ;;  %v1942_v0 = vmul.f32 0.2, %v1936_v17 }
 0x1de   : > { %v1945_v18 = vsel %vm1939_vm13, %v1936_v17, %v1942_v0 }
 0x1df   : > { %1948 = vst [vmem:[%s210_s13 + $0x10] sm:$0xff] %v1945_v18 }
 0x1e0   : > { %2460 = shalt.err (!%p2457_p10)
}
 0x1e1   : > { %s2461_s6 = scalar_lea.hbm %s2895_s22, 384  ;;  %s2465_s8 = scalar_lea.hbm %s2946_s3, 768 }
 0x1e2   : > { %p2462_p11 = scmp.ne.s32.totalorder %s2895_s22, %s2461_s6  ;;  %p2466_p0 = scmp.lt.u32.totalorder %s2895_s22, %s2946_s3 }
 0x1e3   : > { %p2467_p1 = scmp.lt.u32.totalorder %s2465_s8, %s2461_s6  ;;  %p2469_p3 = scmp.lt.u32.totalorder %s2461_s6, %s2895_s22 }
 0x1e4   : > { %p2463_p12 = pnand %p2462_p11, %p2609_p4 }
 0x1e5   : > { %p2468_p2 = por %p2467_p1, %p2466_p0 }
 0x1e6   : > { %p2464_p13 = pneg %p2463_p12 }
 0x1e7   : > { %p2470_p5 = por %p2469_p3, %p2468_p2 }
 0x1e9   : > { %p2471_p6 = pnand %p2470_p5, %p2464_p13 }
 0x1eb   : > { %2474 = shalt.err (!%p2471_p6)
}
 0x1ec   : > { %2341 = dma.vmem_to_hbm [thread:$0]  (%p2609_p4), %s2897_s14, 384, %s2895_s22, %s1982_s24  }
 0x1ed PF: > { %p2352_p7 = scmp.ge.s32.totalorder %s2529_s20, 2  ;;  %s2031_s13 = sand.u32 1, %s2509_s15  }
 0x1ee   : > { %s2032_s10 = scalar_lea.sflag [#allocation3], %s2031_s13 }
 0x1ef   : > { %p2346_p9 = pnand %p2352_p7, %p2616_p8 }
 0x1f1   : > { %2500 = dma.done.wait (!%p2346_p9), %s2032_s10, 384  }
 0x1f2   : > { %2502 = vsyncadd (!%p2346_p9), %s2032_s10, 4294966912  ;;  %s2041_s11 = scalar_lea.sflag [#allocation5], %s2031_s13 }
 0x1f3   : > { %2504 = dma.done.wait (!%p2346_p9), %s2041_s11, 48  }
 0x1f4   : > { %2506 = vsyncadd (!%p2346_p9), %s2041_s11, 4294967248  ;;  %s21_s20 = sadd.s32 1, %s2529_s20   ;;  %s2950_s15 = smov %s2513_s16 }
 0x1f5   : > { %p18_p10 = scmp.ge.s32.totalorder %s21_s20, 4   ;;  %s2951_s16 = smov %s2517_s17 }
 0x1f6   : > { %s2952_s17 = smov %s2622_s28  ;;  %s2953_s18 = smov %s2525_s19 }
 0x1f7   : > { %s2954_s19 = smov %s2956_s23  ;;  %20 = sbr.rel (!%p18_p10) target bundleno = 6 (0x6), region = 93 }
 0x1fe   :  { %2046 = vsyncpa [#allocation3], 1 }
 0x1ff   :  { %2048 = vsyncpa [#allocation3 + $0x1], 1 }
 0x200   :  { %2049 = vsyncpa [#allocation5], 1 }
 0x201   :  { %2051 = vsyncpa [#allocation5 + $0x1], 1 }

</bundles_post_ra>
